<compile_context>
chip_gen: v7x
topology: tpu7x:2x2x1
jax: 0.10.0
libtpu: 0.0.40
codegen_flags: <defaults>
</compile_context>

<pallas_src>
import jax
import jax.numpy as jnp
from jax.experimental import pallas as pl
from jax.experimental.pallas import tpu as pltpu

LANES = 1024                           # lane-dense last dim (multiple of 128)
ACC_ROWS = 8                           # f32 sublane tile; accumulator height
TARGET_BLOCK_BYTES = 8 * 1024 * 1024   # ~8 MiB per input block
VMEM_LIMIT_BYTES = 32 * 1024 * 1024    # 2 x 8 MiB double-buffer + slack


def _round_up(x, m):
    return ((x + m - 1) // m) * m


def _sublane_multiple(dtype):
    itemsize = jnp.dtype(dtype).itemsize
    if itemsize >= 4:
        return 8
    return 8 * (4 // itemsize)         # 16 for bf16/fp16, 32 for int8/fp8


def _pick_block_rows(dtype, rows):
    sub = _sublane_multiple(dtype)
    itemsize = jnp.dtype(dtype).itemsize
    cap = (TARGET_BLOCK_BYTES // (LANES * itemsize)) // sub * sub
    cap = max(cap, sub)
    # Shrink to the (sublane-aligned) array size for small inputs.
    return min(cap, _round_up(rows, sub))


def _make_l1_kernel(rows, block_rows, blocks_per_core, num_blocks, needs_mask):
    def kernel(v_ref, o_ref, acc_ref):
        c = pl.program_id(0)           # core-split axis ("parallel")
        i = pl.program_id(1)           # reduction axis ("arbitrary")

        @pl.when(i == 0)
        def _init():
            acc_ref[...] = jnp.zeros_like(acc_ref)

        def accumulate(vals_f32):
            # Fold the block down to (ACC_ROWS, LANES) with pure VPU adds
            # (leading axis is a batch of vregs -> no XLU work per step).
            part = jnp.abs(vals_f32).reshape(
                block_rows // ACC_ROWS, ACC_ROWS, LANES).sum(axis=0)
            acc_ref[...] += part

        if needs_mask:
            block_idx = c * blocks_per_core + i
            is_tail = block_idx == (num_blocks - 1)

            @pl.when(jnp.logical_not(is_tail))
            def _full_block():
                accumulate(v_ref[...].astype(jnp.float32))

            @pl.when(is_tail)
            def _tail_block():
                # Rows past the real extent of the matrix come from BlockSpec
                # padding with unspecified contents: zero them before |.|.
                valid = rows - block_idx * block_rows
                row_ids = jax.lax.broadcasted_iota(
                    jnp.int32, (block_rows, LANES), 0)
                vals = jnp.where(row_ids < valid,
                                 v_ref[...].astype(jnp.float32),
                                 jnp.float32(0.0))
                accumulate(vals)
        else:
            accumulate(v_ref[...].astype(jnp.float32))

        @pl.when(i == pl.num_programs(1) - 1)
        def _finalize():
            o_ref[0, 0] = jnp.sum(acc_ref[...])   # single XLU reduce per core

    return kernel


def tvnorm_forward(t, x, v, *, min_pallas_elements=32768):
    """Pallas implementation of TVnorm.forward: returns ||v||_1 as a scalar."""
    del t, x  # unused, matching the PyTorch module

    n = v.size
    out_dtype = v.dtype if jnp.issubdtype(v.dtype, jnp.floating) else jnp.float32
    if n == 0:
        return jnp.zeros((), out_dtype)
    if n < min_pallas_elements:
        # Kernel launch + pipeline prologue dwarf the reduction at this size.
        return jnp.sum(jnp.abs(v), dtype=jnp.float32).astype(out_dtype)

    flat = v.reshape(-1)               # native dtype; upcast happens in-kernel
    lane_pad = (-n) % LANES
    if lane_pad:
        # TODO(synk): rare ragged case; jnp.pad materializes one extra HBM copy.
        flat = jnp.pad(flat, (0, lane_pad))
    rows = flat.shape[0] // LANES
    mat = flat.reshape(rows, LANES)

    block_rows = _pick_block_rows(v.dtype, rows)
    num_blocks = pl.cdiv(rows, block_rows)
    # 2-way "parallel" split so both v7x TensorCores drive DMA when the block
    # count divides evenly; otherwise a plain single-core grid.
    num_splits = 2 if (num_blocks >= 4 and num_blocks % 2 == 0) else 1
    blocks_per_core = num_blocks // num_splits
    needs_mask = (rows % block_rows) != 0

    kernel = _make_l1_kernel(rows, block_rows, blocks_per_core,
                             num_blocks, needs_mask)

    partials = pl.pallas_call(
        kernel,
        out_shape=jax.ShapeDtypeStruct((num_splits, 1), jnp.float32),
        grid=(num_splits, blocks_per_core),
        in_specs=[pl.BlockSpec((block_rows, LANES),
                               lambda c, i: (c * blocks_per_core + i, 0))],
        out_specs=pl.BlockSpec((1, 1), lambda c, i: (c, 0),
                               memory_space=pltpu.SMEM),
        scratch_shapes=[pltpu.VMEM((ACC_ROWS, LANES), jnp.float32)],
        compiler_params=pltpu.CompilerParams(
            dimension_semantics=("parallel", "arbitrary"),
            vmem_limit_bytes=VMEM_LIMIT_BYTES),
    )(mat)
    return jnp.sum(partials).astype(out_dtype)


if __name__ == "__main__":
    key = jax.random.PRNGKey(0)
    k_t, k_x, k_v1, k_v2, k_v3 = jax.random.split(key, 5)

    t = jax.random.uniform(k_t, ())
    x = jax.random.normal(k_x, (2, 4, 16, 16), dtype=jnp.float32)

    # 1) Small demo shape: takes the short-circuit (launch overhead dominates).
    v_small = jax.random.normal(k_v1, (2, 4, 16, 16), dtype=jnp.float32)
    r_small = jax.block_until_ready(tvnorm_forward(t, x, v_small))
    assert jnp.allclose(r_small, jnp.sum(jnp.abs(v_small)),
                        rtol=1e-5, atol=1e-4), "small"

    # 2) Same tensor, Pallas path forced: single partial block + tail masking.
    r_forced = jax.block_until_ready(
        tvnorm_forward(t, x, v_small, min_pallas_elements=1))
    assert jnp.allclose(r_forced, jnp.sum(jnp.abs(v_small)),
                        rtol=1e-5, atol=1e-4), "forced"

    # 3) Ragged size (4845 elements): exercises the lane-pad + mask branch.
    v_ragged = jax.random.normal(k_v2, (3, 5, 17, 19), dtype=jnp.float32)
    r_ragged = jax.block_until_ready(
        tvnorm_forward(t, x, v_ragged, min_pallas_elements=1))
    assert jnp.allclose(r_ragged, jnp.sum(jnp.abs(v_ragged)),
                        rtol=1e-5, atol=1e-4), "ragged"

    # 4) Larger tensor: multi-element grid path with a large contiguous block.
    v_big = jax.random.normal(k_v3, (2, 4, 480, 480), dtype=jnp.float32)
    r_big = jax.block_until_ready(tvnorm_forward(t, x, v_big))
    assert jnp.allclose(r_big, jnp.sum(jnp.abs(v_big)),
                        rtol=1e-4, atol=1e-1), "big"

    # 5) bf16 input: native-dtype HBM reads, in-kernel f32 upcast.
    v_bf16 = jax.random.normal(k_v3, (4, 256, 256), dtype=jnp.bfloat16)
    r_bf16 = jax.block_until_ready(tvnorm_forward(t, x, v_bf16))
    ref_bf16 = jnp.sum(jnp.abs(v_bf16.astype(jnp.float32)))
    assert jnp.allclose(r_bf16.astype(jnp.float32), ref_bf16,
                        rtol=2e-2, atol=1.0), "bf16"

    print("KERNEL_OK")
</pallas_src>

<mosaic_0001>
module attributes {stable_mosaic.version = 11 : i64} {
  func.func @kernel(%arg0: i32, %arg1: i32, %arg2: memref<8x1024xf32, #tpu.memory_space<vmem>>, %arg3: memref<1x1xf32, #tpu.memory_space<smem>>, %arg4: memref<8x1024xf32, #tpu.memory_space<vmem>>) attributes {dimension_semantics = [#tpu.dimension_semantics<parallel>, #tpu.dimension_semantics<arbitrary>], iteration_bounds = array<i64: 1, 1>, scalar_prefetch = 0 : i64, scratch_operands = 1 : i64, tpu.core_type = #tpu.core_type<tc>, window_params = [{transform_indices = @transform_0, window_bounds = array<i64: 8, 1024>}, {transform_indices = @transform_1, window_bounds = array<i64: 1, 1>}]} {
    %c0_i32 = arith.constant 0 : i32
    %0 = arith.cmpi eq, %arg1, %c0_i32 : i32
    %1 = arith.extui %0 : i1 to i32
    %c0_i32_0 = arith.constant 0 : i32
    %2 = arith.cmpi ne, %1, %c0_i32_0 : i32
    scf.if %2 {
      %cst = arith.constant 0.000000e+00 : f32
      %14 = vector.broadcast %cst : f32 to vector<8x1024xf32>
      %c0 = arith.constant 0 : index
      %c0_6 = arith.constant 0 : index
      %15 = vector.load %arg4[%c0, %c0_6] : memref<8x1024xf32, #tpu.memory_space<vmem>>, vector<8x1024xf32>
      tpu.vector_store %arg4[%c0, %c0_6], %14 {strides = array<i32>} : memref<8x1024xf32, #tpu.memory_space<vmem>>, vector<8x1024xf32>,
    } else {
    }
    %c1_i32 = arith.constant 1 : i32
    %3 = arith.muli %arg0, %c1_i32 : i32
    %4 = arith.addi %3, %arg1 : i32
    %c0_i32_1 = arith.constant 0 : i32
    %5 = arith.cmpi eq, %4, %c0_i32_1 : i32
    %true = arith.constant true
    %6 = arith.xori %5, %true : i1
    %7 = arith.extui %6 : i1 to i32
    %c0_i32_2 = arith.constant 0 : i32
    %8 = arith.cmpi ne, %7, %c0_i32_2 : i32
    scf.if %8 {
      %c0 = arith.constant 0 : index
      %c0_6 = arith.constant 0 : index
      %14 = vector.load %arg2[%c0, %c0_6] : memref<8x1024xf32, #tpu.memory_space<vmem>>, vector<8x1024xf32>
      %15 = math.absf %14 : vector<8x1024xf32>
      %16 = vector.shape_cast %15 : vector<8x1024xf32> to vector<1x8x1024xf32>
      %cst = arith.constant dense<0.000000e+00> : vector<8x1024xf32>
      %17 = vector.multi_reduction <add>, %16, %cst [0] : vector<1x8x1024xf32> to vector<8x1024xf32>
      %c0_7 = arith.constant 0 : index
      %c0_8 = arith.constant 0 : index
      %18 = vector.load %arg4[%c0_7, %c0_8] : memref<8x1024xf32, #tpu.memory_space<vmem>>, vector<8x1024xf32>
      %19 = arith.addf %18, %17 : vector<8x1024xf32>
      %c0_9 = arith.constant 0 : index
      %c0_10 = arith.constant 0 : index
      %20 = vector.load %arg4[%c0_9, %c0_10] : memref<8x1024xf32, #tpu.memory_space<vmem>>, vector<8x1024xf32>
      tpu.vector_store %arg4[%c0_9, %c0_10], %19 {strides = array<i32>} : memref<8x1024xf32, #tpu.memory_space<vmem>>, vector<8x1024xf32>,
    } else {
    }
    %9 = arith.extui %5 : i1 to i32
    %c0_i32_3 = arith.constant 0 : i32
    %10 = arith.cmpi ne, %9, %c0_i32_3 : i32
    scf.if %10 {
      %c8_i32 = arith.constant 8 : i32
      %14 = arith.muli %4, %c8_i32 : i32
      %c2_i32 = arith.constant 2 : i32
      %15 = arith.subi %c2_i32, %14 : i32
      %16 = tpu.iota {dimensions = array<i32: 0>} : vector<8x1024xi32>
      %17 = vector.broadcast %15 : i32 to vector<8x1024xi32>
      %18 = arith.cmpi slt, %16, %17 : vector<8x1024xi32>
      %c0 = arith.constant 0 : index
      %c0_6 = arith.constant 0 : index
      %19 = vector.load %arg2[%c0, %c0_6] : memref<8x1024xf32, #tpu.memory_space<vmem>>, vector<8x1024xf32>
      %cst = arith.constant 0.000000e+00 : f32
      %20 = vector.broadcast %cst : f32 to vector<8x1024xf32>
      %21 = arith.select %18, %19, %20 : vector<8x1024xi1>, vector<8x1024xf32>
      %22 = math.absf %21 : vector<8x1024xf32>
      %23 = vector.shape_cast %22 : vector<8x1024xf32> to vector<1x8x1024xf32>
      %cst_7 = arith.constant dense<0.000000e+00> : vector<8x1024xf32>
      %24 = vector.multi_reduction <add>, %23, %cst_7 [0] : vector<1x8x1024xf32> to vector<8x1024xf32>
      %c0_8 = arith.constant 0 : index
      %c0_9 = arith.constant 0 : index
      %25 = vector.load %arg4[%c0_8, %c0_9] : memref<8x1024xf32, #tpu.memory_space<vmem>>, vector<8x1024xf32>
      %26 = arith.addf %25, %24 : vector<8x1024xf32>
      %c0_10 = arith.constant 0 : index
      %c0_11 = arith.constant 0 : index
      %27 = vector.load %arg4[%c0_10, %c0_11] : memref<8x1024xf32, #tpu.memory_space<vmem>>, vector<8x1024xf32>
      tpu.vector_store %arg4[%c0_10, %c0_11], %26 {strides = array<i32>} : memref<8x1024xf32, #tpu.memory_space<vmem>>, vector<8x1024xf32>,
    } else {
    }
    %c0_i32_4 = arith.constant 0 : i32
    %11 = arith.cmpi eq, %arg1, %c0_i32_4 : i32
    %12 = arith.extui %11 : i1 to i32
    %c0_i32_5 = arith.constant 0 : i32
    %13 = arith.cmpi ne, %12, %c0_i32_5 : i32
    scf.if %13 {
      %c0 = arith.constant 0 : index
      %c0_6 = arith.constant 0 : index
      %14 = vector.load %arg4[%c0, %c0_6] : memref<8x1024xf32, #tpu.memory_space<vmem>>, vector<8x1024xf32>
      %15 = vector.shape_cast %14 : vector<8x1024xf32> to vector<1x8x1024xf32>
      %cst = arith.constant dense<0.000000e+00> : vector<1xf32>
      %16 = vector.multi_reduction <add>, %15, %cst [1, 2] : vector<1x8x1024xf32> to vector<1xf32>
      %17 = vector.shape_cast %16 : vector<1xf32> to vector<1x1x1xf32>
      %18 = vector.extract %17[0, 0, 0] : f32 from vector<1x1x1xf32>
      %c0_7 = arith.constant 0 : index
      %c0_8 = arith.constant 0 : index
      %19 = memref.load %arg3[%c0_7, %c0_8] : memref<1x1xf32, #tpu.memory_space<smem>>
      memref.store %18, %arg3[%c0_7, %c0_8] : memref<1x1xf32, #tpu.memory_space<smem>>
    } else {
    }
    return
  }
  func.func @transform_0(%arg0: i32, %arg1: i32) -> (i32, i32) {
    %c1_i32 = arith.constant 1 : i32
    %0 = arith.muli %arg0, %c1_i32 : i32
    %1 = arith.addi %0, %arg1 : i32
    %c0_i32 = arith.constant 0 : i32
    %c0_i32_0 = arith.constant 0 : i32
    return %1, %c0_i32 : i32, i32
  }
  func.func @transform_1(%arg0: i32, %arg1: i32) -> (i32, i32) {
    %c0_i32 = arith.constant 0 : i32
    %c0_i32_0 = arith.constant 0 : i32
    return %arg0, %c0_i32 : i32, i32
  }
}

</mosaic_0001>

<bundles_post_ra>
// kernel: tpu_custom_call.1
= control target key start
LH: loop header
LB: loop body
LE: loop exit
PB: predicated region body
PF: predicated region fallthrough
CT: control target
= control target key end

     0   :  { %6 = vsyncpa [#allocation4], 0  ;;  %s490_s0 = inlined_call_operand.hbm [shape: f32[2,1024], index: 0, kind: input, shape index: {}]   ;;  %s491_s1 = inlined_call_operand.hbm [shape: f32[1,1], index: 1, kind: output, shape index: {}]  }
   0x1   :  { %7 = vsyncpa [#allocation5], 0 }
   0x2   :  { %17 = vsyncadd [#allocation4], 768  ;;  %s443_s6 = smov [#allocation3]   ;;  %s407_s10 = scalar_lea.hbm %s490_s0, 256 }
   0x3   :  { %s23_s7 = sshll.u32 %s443_s6, 4  ;;  %p408_p0 = scmp.ne.s32.totalorder %s490_s0, %s407_s10  ;;  %s24_s7 = int_to_ptr.vmem [resolvable:$true] %s23_s7 }
   0x4   :  { %p411_p1 = scmp.lt.u32.totalorder %s407_s10, %s490_s0 }
   0x6   :  { %p413_p2 = pnand %p411_p1, %p408_p0 }
   0x8   :  { %416 = shalt.err (!%p413_p2)
}
   0x9   :  { %s417_s15 = scalar_lea.vmem %s24_s7, 256  ;;  %s421_s16 = scalar_lea.vmem %s24_s7, 1024 }
   0xa   :  { %p418_p3 = scmp.ne.s32.totalorder %s24_s7, %s417_s15  ;;  %p422_p4 = scmp.lt.s32.totalorder %s24_s7, %s24_s7 }
   0xb   :  { %p423_p5 = scmp.lt.s32.totalorder %s421_s16, %s417_s15 }
   0xd   :  { %p424_p6 = por %p423_p5, %p422_p4 }
   0xf   :  { %p425_p7 = pnand %p424_p6, %p418_p3 }
  0x11   :  { %428 = shalt.err (!%p425_p7)
}
  0x12   :  { %s444_s17 = smov 256   ;;  %s445_s18 = smov 16  }
  0x13   :  { %29 = dma.hbm_to_vmem [thread:$0]  %s490_s0, 256, %s24_s7, [#allocation4], %s444_s17, %s444_s17, %s445_s18  }
  0x14   :  { %439 = dma.done.wait [#allocation4], 1024  }
  0x15   :  { %440 = vsyncadd [#allocation4], 4294966272  ;;  %v197_v0 = vlaneseq  ;;  %v446_v1 = vmov 1983009808   ;;  %v395_v6 = vld [vmem:[#allocation3] ss:$16 sps:$4 sm:$0xff]  }
  0x16   :  { %v222_v2 = vunpack.c.l.s4 %v446_v1  ;;  %v397_v7 = vld [vmem:[#allocation3 + $0x4] ss:$16 sps:$4 sm:$0xff]   ;;  %v398_v8 = vld [vmem:[#allocation3 + $0x20] ss:$16 sps:$4 sm:$0xff]   ;;  %v401_v11 = vld [vmem:[#allocation3 + $0x8] ss:$16 sps:$4 sm:$0xff]  }
  0x17   :  { %v198_v3 = vshrl.u32 %v197_v0, 7  ;;  %v400_v9 = vld [vmem:[#allocation3 + $0x24] ss:$16 sps:$4 sm:$0xff]   ;;  %v403_v12 = vld [vmem:[#allocation3 + $0xc] ss:$16 sps:$4 sm:$0xff]   ;;  %s429_s23 = scalar_lea.hbm %s491_s1, 16 }
  0x18   :  { %v223_v4 = vunpack.c.0.s8 %v222_v2  ;;  %v404_v13 = vld [vmem:[#allocation3 + $0x28] ss:$16 sps:$4 sm:$0xff]   ;;  %v406_v17 = vld [vmem:[#allocation3 + $0x2c] ss:$16 sps:$4 sm:$0xff]   ;;  %p430_p8 = scmp.ne.s32.totalorder %s491_s1, %s429_s23  ;;  %p433_p9 = scmp.lt.u32.totalorder %s429_s23, %s491_s1 }
  0x19   :  { %vm200_vm0 = vcmp.lt.s32.totalorder %v198_v3, 2 }
  0x1a   :  { %v226_v5 = vsub.s32 %v223_v4, %v198_v3  ;;  %p435_p10 = pnand %p433_p9, %p430_p8 }
  0x1c   :  { %v227_v10 = vrot.slane %v395_v6, %v226_v5  ;;  %v234_v14 = vrot.slane %v397_v7, %v226_v5  ;;  %v241_v15 = vrot.slane %v398_v8, %v226_v5  ;;  %v248_v16 = vrot.slane %v400_v9, %v226_v5 }
  0x1d   :  { %v263_v18 = vrot.slane %v401_v11, %v226_v5  ;;  %v277_v19 = vrot.slane %v404_v13, %v226_v5  ;;  %v270_v24 = vrot.slane %v403_v12, %v226_v5  ;;  %v284_v25 = vrot.slane %v406_v17, %v226_v5 }
  0x1e   :  { %v249_v20 = vcombine.low %v227_v10, %v241_v15  ;;  %v250_v21 = vcombine.high %v227_v10, %v241_v15  ;;  %v251_v22 = vcombine.low %v234_v14, %v248_v16  ;;  %v252_v23 = vcombine.high %v234_v14, %v248_v16 }
  0x1f   :  { %v285_v26 = vcombine.low %v263_v18, %v277_v19  ;;  %v286_v30 = vcombine.high %v263_v18, %v277_v19  ;;  %v287_v35 = vcombine.low %v270_v24, %v284_v25  ;;  %v288_v39 = vcombine.high %v270_v24, %v284_v25 }
  0x20   :  { %v297_v27 = vsel %vm200_vm0, %v249_v20, 0.0  ;;  %v298_v28 = vsel %vm200_vm0, %v250_v21, 0.0  ;;  %v299_v29 = vsel %vm200_vm0, %v251_v22, 0.0  ;;  %v300_v31 = vsel %vm200_vm0, %v252_v23, 0.0 }
  0x21   :  { %v305_v32 = vand.u32 2147483647, %v297_v27  ;;  %v306_v33 = vand.u32 2147483647, %v298_v28  ;;  %v307_v34 = vand.u32 2147483647, %v299_v29 }
  0x22   :  { %v301_v36 = vsel %vm200_vm0, %v285_v26, 0.0  ;;  %v308_v37 = vand.u32 2147483647, %v300_v31  ;;  %v302_v40 = vsel %vm200_vm0, %v286_v30, 0.0  ;;  %v303_v43 = vsel %vm200_vm0, %v287_v35, 0.0 }
  0x23   :  { %v356_v38 = vadd.f32 %v306_v33, %v305_v32  ;;  %v309_v41 = vand.u32 2147483647, %v301_v36  ;;  %v310_v44 = vand.u32 2147483647, %v302_v40  ;;  %v304_v46 = vsel %vm200_vm0, %v288_v39, 0.0 }
  0x24   :  { %v311_v47 = vand.u32 2147483647, %v303_v43  ;;  %v312_v49 = vand.u32 2147483647, %v304_v46 }
  0x25   :  { %v357_v42 = vadd.f32 %v356_v38, %v307_v34 }
  0x27   :  { %v358_v45 = vadd.f32 %v357_v42, %v308_v37 }
  0x29   :  { %v359_v48 = vadd.f32 %v358_v45, %v309_v41 }
  0x2b   :  { %v360_v50 = vadd.f32 %v359_v48, %v310_v44 }
  0x2d   :  { %v361_v51 = vadd.f32 %v360_v50, %v311_v47 }
  0x2f   :  { %v362_v52 = vadd.f32 %v361_v51, %v312_v49 }
  0x31   :  { %363 = vadd.xlane.f32.xlu0 %v362_v52 }
  0xbe   :  { %v364_v53 = vpop.xlane.xlu0 %363 }
  0xbf   :  { %v365_v54 = vrot.slane %v364_v53, 4 }
  0xc1   :  { %v366_v55 = vadd.f32 %v365_v54, %v364_v53 }
  0xc3   :  { %v367_v56 = vrot.slane %v366_v55, 2 }
  0xc5   :  { %v368_v57 = vadd.f32 %v367_v56, %v366_v55 }
  0xc7   :  { %v369_v58 = vrot.slane %v368_v57, 1 }
  0xc9   :  { %v370_v59 = vadd.f32 %v369_v58, %v368_v57 }
  0xcb   :  { %388 = vpush %v370_v59 }
  0xfc   :  { %s389_s0 = spop %388 }
  0xfd   :  { %373 = sst [smem:[#allocation6]] %s389_s0 }
  0xfe   :  { %438 = shalt.err (!%p435_p10)
}
  0xff   :  { %s447_s28 = smov [#allocation6]  }
 0x100   :  { %381 = dma.smem_to_hbm %s447_s28, 16, %s491_s1, [#allocation5]  }
 0x101   :  { %441 = dma.done.wait [#allocation5], 16  }
 0x102   :  { %442 = vsyncadd [#allocation5], 4294967280 }
 0x103   :  { %385 = sfence }
 0x104   :  { %386 = vsyncpa [#allocation4], 1 }
 0x105   :  { %387 = vsyncpa [#allocation5], 1 }

</bundles_post_ra>
